<compile_context>
chip_gen: v7x
topology: tpu7x:2x2x1
jax: 0.10.0
libtpu: 0.0.40
codegen_flags: <defaults>
</compile_context>

<pallas_src>
import jax
import jax.numpy as jnp
from jax.experimental import pallas as pl
from jax.experimental.pallas import tpu as pltpu


def _round_up(x, m):
    return ((x + m - 1) // m) * m


def _device_kind():
    try:
        return jax.devices()[0].device_kind.lower()
    except Exception:
        return ""


def _vmem_capacity_bytes(kind):
    try:
        return int(pltpu.get_tpu_info().vmem_capacity_bytes)
    except Exception:
        return (64 << 20) if "v7" in kind else (128 << 20)


def _default_tiles(kind):
    """(tm, tf) targets per TPU generation (weight-streaming roofline + VMEM)."""
    if "v5" in kind:
        # v5e: knee ~240 FLOP/byte -> tm=256 already compute-bound; 128-wide MXU.
        return 256, 128
    if "v7" in kind:
        # v7x: 64 MiB VMEM; tm=512/tf=128 ~55 MiB footprint, crosses the knee.
        return 512, 128
    # v6e (default): 128 MiB VMEM, knee ~650 FLOP/byte -> large token tile.
    return 768, 256


def arctic_mlp_kernel(x_ref, w1_ref, w3_ref, w2_ref, o_ref, acc_ref):
    """One (token tile i, ffn tile j) grid step.

    x_ref  : (tm, H)  bf16   token tile (resident across j)
    w1_ref : (H, tf)  bf16   column tile of w1
    w3_ref : (H, tf)  bf16   column tile of w3
    w2_ref : (tf, H)  bf16   row tile of w2
    o_ref  : (tm, H)  bf16   output tile (written on the last j)
    acc_ref: (tm, H)  f32    VMEM accumulator scratch
    """
    j = pl.program_id(1)

    # Two up-projections on the MXU, accumulated in f32 (no bf16 round-trip).
    h1 = jnp.dot(x_ref[...], w1_ref[...], preferred_element_type=jnp.float32)
    h3 = jnp.dot(x_ref[...], w3_ref[...], preferred_element_type=jnp.float32)

    # SwiGLU gate in f32 (sigmoid runs on the EUP); one bf16 cast for the MXU.
    g = (h1 * jax.nn.sigmoid(h1)) * h3

    # Down-projection partial for this F tile.
    part = jnp.dot(g.astype(jnp.bfloat16), w2_ref[...],
                   preferred_element_type=jnp.float32)

    @pl.when(j == 0)
    def _first():
        acc_ref[...] = part          # skip zero-init + RMW on the first tile

    @pl.when(j > 0)
    def _accum():
        acc_ref[...] += part

    @pl.when(j == pl.num_programs(1) - 1)
    def _finalize():
        o_ref[...] = acc_ref[...].astype(o_ref.dtype)


def arctic_mlp(hidden_states, w1, w3, w2, *, tm=None, tf=None):
    """hidden_states: [B, S, H] bf16; w1, w3: [H, F]; w2: [F, H] (pre-transposed)."""
    B, S, H = hidden_states.shape
    F = w1.shape[1]
    assert w3.shape == (H, F) and w2.shape == (F, H)

    kind = _device_kind()
    tm_d, tf_d = _default_tiles(kind)
    tm = tm_d if tm is None else tm
    tf = tf_d if tf is None else tf

    T = B * S
    x = hidden_states.reshape(T, H).astype(jnp.bfloat16)

    # --- token tiling (multiple of 16 for bf16 sublane packing) --------------
    tm = int(max(16, min(_round_up(tm, 16), _round_up(T, 16))))
    T_pad = _round_up(T, tm)
    if T_pad != T:
        x = jnp.pad(x, ((0, T_pad - T), (0, 0)))    # zero tail rows, sliced off

    # --- F tiling: pad F to a multiple of 128, pick a 128-aligned divisor ----
    # (For Arctic's production intermediate sizes F is already a multiple of
    # 128, so this padding is a no-op there; ideally hoist it to weight-load.)
    F_pad = _round_up(F, 128)
    tf_target = max(128, (int(tf) // 128) * 128)
    tf = 128
    c = min(tf_target, F_pad)
    while c >= 128:
        if F_pad % c == 0:
            tf = c
            break
        c -= 128
    nF = F_pad // tf

    w1 = w1.astype(jnp.bfloat16)
    w3 = w3.astype(jnp.bfloat16)
    w2 = w2.astype(jnp.bfloat16)
    if F_pad != F:
        w1 = jnp.pad(w1, ((0, 0), (0, F_pad - F)))
        w3 = jnp.pad(w3, ((0, 0), (0, F_pad - F)))
        w2 = jnp.pad(w2, ((0, F_pad - F), (0, 0)))

    # --- scheduler hints ------------------------------------------------------
    n_tok_tiles = T_pad // tm
    flops = 6 * T_pad * H * F_pad                      # 3 matmuls of 2*T*H*F
    bytes_accessed = (T_pad * H * 2 * 2                # x in + out (bf16)
                      + 3 * H * F_pad * 2 * n_tok_tiles)  # weights re-streamed
    cost = pl.CostEstimate(flops=int(flops),
                           transcendentals=int(T_pad * F_pad),
                           bytes_accessed=int(bytes_accessed))

    # --- VMEM budget (single-counted double buffers + temp headroom) ---------
    bf = 2
    tile_bytes = (2 * tm * H * bf            # x, double-buffered
                  + 2 * 2 * H * tf * bf      # w1 + w3, double-buffered
                  + 2 * tf * H * bf          # w2, double-buffered
                  + 2 * tm * H * bf          # out, double-buffered
                  + tm * H * 4)              # f32 accumulator scratch
    temps = 3 * tm * tf * 4 + tm * tf * bf   # h1/h3/g f32 + g bf16 cast
    cap = _vmem_capacity_bytes(kind)
    vmem_limit = int(min(max(tile_bytes + temps + (4 << 20), 16 << 20),
                         cap - (2 << 20)))

    # TODO(synk): for decode-sized T (single token tile) on v7x, split the F
    # axis across the two TensorCores (per-core partial accumulators + one
    # cross-core add) instead of leaving one core idle.

    out = pl.pallas_call(
        arctic_mlp_kernel,
        out_shape=jax.ShapeDtypeStruct((T_pad, H), jnp.bfloat16),
        grid_spec=pltpu.PrefetchScalarGridSpec(
            num_scalar_prefetch=0,
            grid=(n_tok_tiles, nF),                      # reduction axis (F) last
            in_specs=[
                pl.BlockSpec((tm, H), lambda i, j: (i, 0)),   # x tile
                pl.BlockSpec((H, tf), lambda i, j: (0, j)),   # w1 column tile
                pl.BlockSpec((H, tf), lambda i, j: (0, j)),   # w3 column tile
                pl.BlockSpec((tf, H), lambda i, j: (j, 0)),   # w2 row tile
            ],
            out_specs=pl.BlockSpec((tm, H), lambda i, j: (i, 0)),
            scratch_shapes=[pltpu.VMEM((tm, H), jnp.float32)],
        ),
        compiler_params=pltpu.CompilerParams(
            dimension_semantics=("parallel", "arbitrary"),
            vmem_limit_bytes=vmem_limit,
        ),
        cost_estimate=cost,
    )(x, w1, w3, w2)

    return out[:T].reshape(B, S, H)


def reference_mlp(hidden_states, w1, w3, w2):
    """Pure-JAX reference (f32 math on the same bf16 params)."""
    x = hidden_states.astype(jnp.float32)
    h1 = x @ w1.astype(jnp.float32)
    h3 = x @ w3.astype(jnp.float32)
    g = (h1 * jax.nn.sigmoid(h1)) * h3
    return (g @ w2.astype(jnp.float32)).astype(jnp.bfloat16)


if __name__ == "__main__":
    # Small ArcticConfig-like sizes. S=9 exercises token padding; F=320
    # exercises the F->384 padding path; tf=128 exercises the multi-step
    # F reduction (3 grid steps along the accumulation axis).
    B, S, H, F = 2, 9, 128, 320

    key = jax.random.PRNGKey(0)
    kx, k1, k2, k3 = jax.random.split(key, 4)

    hidden_states = (jax.random.normal(kx, (B, S, H), dtype=jnp.float32)
                     .astype(jnp.bfloat16))

    # nn.Linear-style init (uniform in +-1/sqrt(fan_in)), stored as [in, out].
    def init_w(k, fan_in, fan_out):
        bound = 1.0 / (fan_in ** 0.5)
        return (jax.random.uniform(k, (fan_in, fan_out), minval=-bound,
                                   maxval=bound, dtype=jnp.float32)
                .astype(jnp.bfloat16))

    w1 = init_w(k1, H, F)   # hidden -> ffn
    w3 = init_w(k3, H, F)   # hidden -> ffn
    w2 = init_w(k2, F, H)   # ffn -> hidden

    out = arctic_mlp(hidden_states, w1, w3, w2, tm=256, tf=128)
    out = jax.block_until_ready(out)

    ref = reference_mlp(hidden_states.reshape(B * S, H), w1, w3, w2).reshape(B, S, H)
    assert out.shape == (B, S, H) and out.dtype == jnp.bfloat16
    err = jnp.max(jnp.abs(out.astype(jnp.float32) - ref.astype(jnp.float32)))
    assert float(err) < 5e-2, f"mismatch vs reference: {err}"

    print("KERNEL_OK")
</pallas_src>

<mosaic_0001>
module attributes {stable_mosaic.version = 11 : i64} {
  func.func @arctic_mlp_kernel(%arg0: i32, %arg1: i32, %arg2: memref<32x128xbf16, #tpu.memory_space<vmem>>, %arg3: memref<128x128xbf16, #tpu.memory_space<vmem>>, %arg4: memref<128x128xbf16, #tpu.memory_space<vmem>>, %arg5: memref<128x128xbf16, #tpu.memory_space<vmem>>, %arg6: memref<32x128xbf16, #tpu.memory_space<vmem>>, %arg7: memref<32x128xf32, #tpu.memory_space<vmem>>) attributes {dimension_semantics = [#tpu.dimension_semantics<parallel>, #tpu.dimension_semantics<arbitrary>], iteration_bounds = array<i64: 1, 3>, scalar_prefetch = 0 : i64, scratch_operands = 1 : i64, tpu.core_type = #tpu.core_type<tc>, window_params = [{transform_indices = @transform_0, window_bounds = array<i64: 32, 128>}, {transform_indices = @transform_1, window_bounds = array<i64: 128, 128>}, {transform_indices = @transform_2, window_bounds = array<i64: 128, 128>}, {transform_indices = @transform_3, window_bounds = array<i64: 128, 128>}, {transform_indices = @transform_4, window_bounds = array<i64: 32, 128>}]} {
    %c0 = arith.constant 0 : index
    %c0_0 = arith.constant 0 : index
    %0 = vector.load %arg2[%c0, %c0_0] : memref<32x128xbf16, #tpu.memory_space<vmem>>, vector<32x128xbf16>
    %c0_1 = arith.constant 0 : index
    %c0_2 = arith.constant 0 : index
    %1 = vector.load %arg3[%c0_1, %c0_2] : memref<128x128xbf16, #tpu.memory_space<vmem>>, vector<128x128xbf16>
    %cst = arith.constant dense<0.000000e+00> : vector<32x128xf32>
    %2 = tpu.matmul %0, %1, %cst {dimension_numbers = #tpu.dot_dimension_numbers<[1], [0], [0], [1], [0, 0, 1, 1], [], []>} : vector<32x128xbf16>, vector<128x128xbf16>, vector<32x128xf32> -> vector<32x128xf32>
    %c0_3 = arith.constant 0 : index
    %c0_4 = arith.constant 0 : index
    %3 = vector.load %arg2[%c0_3, %c0_4] : memref<32x128xbf16, #tpu.memory_space<vmem>>, vector<32x128xbf16>
    %c0_5 = arith.constant 0 : index
    %c0_6 = arith.constant 0 : index
    %4 = vector.load %arg4[%c0_5, %c0_6] : memref<128x128xbf16, #tpu.memory_space<vmem>>, vector<128x128xbf16>
    %cst_7 = arith.constant dense<0.000000e+00> : vector<32x128xf32>
    %5 = tpu.matmul %3, %4, %cst_7 {dimension_numbers = #tpu.dot_dimension_numbers<[1], [0], [0], [1], [0, 0, 1, 1], [], []>} : vector<32x128xbf16>, vector<128x128xbf16>, vector<32x128xf32> -> vector<32x128xf32>
    %6 = arith.negf %2 : vector<32x128xf32>
    %7 = math.exp %6 : vector<32x128xf32>
    %cst_8 = arith.constant 1.000000e+00 : f32
    %8 = vector.broadcast %cst_8 : f32 to vector<32x128xf32>
    %9 = arith.addf %8, %7 : vector<32x128xf32>
    %10 = arith.divf %8, %9 : vector<32x128xf32>
    %11 = arith.mulf %2, %10 : vector<32x128xf32>
    %12 = arith.mulf %11, %5 : vector<32x128xf32>
    %13 = arith.truncf %12 : vector<32x128xf32> to vector<32x128xbf16>
    %c0_9 = arith.constant 0 : index
    %c0_10 = arith.constant 0 : index
    %14 = vector.load %arg5[%c0_9, %c0_10] : memref<128x128xbf16, #tpu.memory_space<vmem>>, vector<128x128xbf16>
    %cst_11 = arith.constant dense<0.000000e+00> : vector<32x128xf32>
    %15 = tpu.matmul %13, %14, %cst_11 {dimension_numbers = #tpu.dot_dimension_numbers<[1], [0], [0], [1], [0, 0, 1, 1], [], []>} : vector<32x128xbf16>, vector<128x128xbf16>, vector<32x128xf32> -> vector<32x128xf32>
    %c0_i32 = arith.constant 0 : i32
    %16 = arith.cmpi eq, %arg1, %c0_i32 : i32
    %17 = arith.extui %16 : i1 to i32
    %c0_i32_12 = arith.constant 0 : i32
    %18 = arith.cmpi ne, %17, %c0_i32_12 : i32
    scf.if %18 {
      %c0_16 = arith.constant 0 : index
      %c0_17 = arith.constant 0 : index
      %25 = vector.load %arg7[%c0_16, %c0_17] : memref<32x128xf32, #tpu.memory_space<vmem>>, vector<32x128xf32>
      tpu.vector_store %arg7[%c0_16, %c0_17], %15 {strides = array<i32>} : memref<32x128xf32, #tpu.memory_space<vmem>>, vector<32x128xf32>,
    } else {
    }
    %c0_i32_13 = arith.constant 0 : i32
    %19 = arith.cmpi sgt, %arg1, %c0_i32_13 : i32
    %20 = arith.extui %19 : i1 to i32
    %c0_i32_14 = arith.constant 0 : i32
    %21 = arith.cmpi ne, %20, %c0_i32_14 : i32
    scf.if %21 {
      %c0_16 = arith.constant 0 : index
      %c0_17 = arith.constant 0 : index
      %25 = vector.load %arg7[%c0_16, %c0_17] : memref<32x128xf32, #tpu.memory_space<vmem>>, vector<32x128xf32>
      %26 = arith.addf %25, %15 : vector<32x128xf32>
      %c0_18 = arith.constant 0 : index
      %c0_19 = arith.constant 0 : index
      %27 = vector.load %arg7[%c0_18, %c0_19] : memref<32x128xf32, #tpu.memory_space<vmem>>, vector<32x128xf32>
      tpu.vector_store %arg7[%c0_18, %c0_19], %26 {strides = array<i32>} : memref<32x128xf32, #tpu.memory_space<vmem>>, vector<32x128xf32>,
    } else {
    }
    %c2_i32 = arith.constant 2 : i32
    %22 = arith.cmpi eq, %arg1, %c2_i32 : i32
    %23 = arith.extui %22 : i1 to i32
    %c0_i32_15 = arith.constant 0 : i32
    %24 = arith.cmpi ne, %23, %c0_i32_15 : i32
    scf.if %24 {
      %c0_16 = arith.constant 0 : index
      %c0_17 = arith.constant 0 : index
      %25 = vector.load %arg7[%c0_16, %c0_17] : memref<32x128xf32, #tpu.memory_space<vmem>>, vector<32x128xf32>
      %26 = arith.truncf %25 : vector<32x128xf32> to vector<32x128xbf16>
      %c0_18 = arith.constant 0 : index
      %c0_19 = arith.constant 0 : index
      %27 = vector.load %arg6[%c0_18, %c0_19] : memref<32x128xbf16, #tpu.memory_space<vmem>>, vector<32x128xbf16>
      tpu.vector_store %arg6[%c0_18, %c0_19], %26 {strides = array<i32>} : memref<32x128xbf16, #tpu.memory_space<vmem>>, vector<32x128xbf16>,
    } else {
    }
    return
  }
  func.func @transform_0(%arg0: i32, %arg1: i32) -> (i32, i32) {
    %c0_i32 = arith.constant 0 : i32
    %c0_i32_0 = arith.constant 0 : i32
    return %arg0, %c0_i32 : i32, i32
  }
  func.func @transform_1(%arg0: i32, %arg1: i32) -> (i32, i32) {
    %c0_i32 = arith.constant 0 : i32
    %c0_i32_0 = arith.constant 0 : i32
    return %c0_i32, %arg1 : i32, i32
  }
  func.func @transform_2(%arg0: i32, %arg1: i32) -> (i32, i32) {
    %c0_i32 = arith.constant 0 : i32
    %c0_i32_0 = arith.constant 0 : i32
    return %c0_i32, %arg1 : i32, i32
  }
  func.func @transform_3(%arg0: i32, %arg1: i32) -> (i32, i32) {
    %c0_i32 = arith.constant 0 : i32
    %c0_i32_0 = arith.constant 0 : i32
    return %arg1, %c0_i32 : i32, i32
  }
  func.func @transform_4(%arg0: i32, %arg1: i32) -> (i32, i32) {
    %c0_i32 = arith.constant 0 : i32
    %c0_i32_0 = arith.constant 0 : i32
    return %arg0, %c0_i32 : i32, i32
  }
}

</mosaic_0001>

<bundles_post_ra>
// kernel: tpu_custom_call.1
= control target key start
LH: loop header
LB: loop body
LE: loop exit
PB: predicated region body
PF: predicated region fallthrough
CT: control target
= control target key end

     0   :  { %s1744_s0 = inlined_call_operand.hbm [shape: bf16[32,128], index: 0, kind: input, shape index: {}]   ;;  %s1745_s1 = inlined_call_operand.hbm [shape: bf16[128,384], index: 1, kind: input, shape index: {}]   ;;  %s1746_s2 = inlined_call_operand.hbm [shape: bf16[128,384], index: 2, kind: input, shape index: {}]   ;;  %s1747_s3 = inlined_call_operand.hbm [shape: bf16[384,128], index: 3, kind: input, shape index: {}]   ;;  %s1748_s4 = inlined_call_operand.hbm [shape: bf16[32,128], index: 4, kind: output, shape index: {}]  }
   0x1   :  { %1760 = sst [smem:[#allocation16_spill]] %s1745_s1 }
   0x2   :  { %1761 = sst [smem:[#allocation17_spill]] %s1746_s2 }
   0x3   :  { %9 = vsyncpa [#allocation4], 0 }
   0x4   :  { %10 = vsyncpa [#allocation7], 0 }
   0x5   :  { %12 = vsyncpa [#allocation7 + $0x1], 0 }
   0x6   :  { %13 = vsyncpa [#allocation10], 0 }
   0x7   :  { %15 = vsyncpa [#allocation10 + $0x1], 0 }
   0x8   :  { %16 = vsyncpa [#allocation5], 0  ;;  %s1430_s15 = smov 0   ;;  %s1432_s16 = smov 0  }
   0x9   :  { %s1434_s17 = smov 0   ;;  %s1436_s18 = smov 0  }
   0xa   :  { %s1438_s19 = smov 0   ;;  %s1440_s20 = smov 0  }
   0xb LB: > { %s31_s21 = sadd.s32 1, %s1389_s19  ;;  %s67_s22 = sadd.s32 1, %s1381_s17  ;;  %s1393_s20 = sphi %s1440_s20, %s22_s20   ;;  %s1389_s19 = sphi %s1438_s19, %s1784_s19   ;;  %s1385_s18 = sphi %s1436_s18, %s1783_s18   ;;  %s1381_s17 = sphi %s1434_s17, %s1782_s17   ;;  %s1377_s16 = sphi %s1432_s16, %s1781_s16   ;;  %s1373_s15 = sphi %s1430_s15, %s1780_s15  }
   0xc   : > { %p32_p0 = scmp.ge.s32.totalorder %s31_s21, 3  ;;  %p74_p1 = scmp.ne.s32.totalorder %s1381_s17, %s1377_s16 }
   0xd   : > { %p75_p2 = scmp.eq.s32.totalorder %s1393_s20, 0  ;;  %p1086_p5 = scmp.lt.s32.totalorder %s1393_s20, 3 }
   0xe   : > { %s1786_s21 = smov (%p32_p0, %s31_s21), 0  ;;  %s198_s25 = sand.u32 1, %s1393_s20  }
   0xf   : > { %p1467_p3 = por %p75_p2, %p74_p1  ;;  %s64_s24 = ssub.s32 %s1389_s19, %s1786_s21 }
  0x10   : > { %p65_p4 = scmp.eq.s32.totalorder %s64_s24, 0  ;;  %s1749_s26 = sand.u32 1, %s1381_s17  }
  0x11   : > { %s1481_s28 = sshll.u32 %s1749_s26, 6  ;;  %s899_s29 = sshll.u32 %s1389_s19, 6 }
  0x12   : > { %s1477_s27 = scalar_select %p65_p4, %s1381_s17, %s67_s22  }
  0x13   : > { %s1763_s1 = sld [smem:[#allocation16_spill]]  ;;  %s202_s7 = scalar_lea.vmem [#allocation6], %s1481_s28 }
  0x14   : > { %s208_s8 = sshll.u32 %s202_s7, 4  ;;  %p1494_p6 = pnand %p1086_p5, %p1467_p3  ;;  %s1490_s8 = int_to_ptr.vmem [resolvable:$true] %s208_s8 }
  0x15   : > { %s1765_s2 = sld [smem:[#allocation17_spill]]  ;;  %s1503_s13 = scalar_lea.sflag [#allocation7], %s198_s25 }
  0x16   : > { %s1764_s9 = scalar_select %p1494_p6, 1, 0 }
  0x17   : > { %p1509_p8 = pneg %p1494_p6 }
  0x19   : > { %s1487_s6 = scalar_lea.hbm %s1763_s1, %s899_s29  ;;  %s1192_s30 = scalar_lea.hbm %s1763_s1, 3072 }
  0x1a   : > { %s1187_s14 = scalar_lea.hbm %s1487_s6, 1024  ;;  %p1193_p11 = scmp.lt.u32.totalorder %s1487_s6, %s1763_s1 }
  0x1b   : > { %s1501_s12 = scalar_lea.hbm %s1765_s2, %s899_s29  ;;  %p1188_p7 = scmp.ne.s32.totalorder %s1487_s6, %s1187_s14 }
  0x1c   : > { %s1766_s22 = scalar_select %p1509_p8, 1, 0 }
  0x1d   : > { %p1190_p9 = pnand %p1509_p8, %p1188_p7  ;;  %p1194_p12 = scmp.lt.u32.totalorder %s1192_s30, %s1187_s14 }
  0x1e   : > { %p1196_p0 = scmp.lt.u32.totalorder %s1187_s14, %s1487_s6 }
  0x1f   : > { %p1191_p10 = pneg %p1190_p9  ;;  %p1195_p13 = por %p1194_p12, %p1193_p11 }
  0x21   : > { %p1197_p1 = por %p1196_p0, %p1195_p13 }
  0x23   : > { %p1198_p2 = pnand %p1197_p1, %p1191_p10 }
  0x25   : > { %1201 = shalt.err (!%p1198_p2)
}
  0x26   : > { %s1202_s25 = scalar_lea.vmem %s1490_s8, 1024  ;;  %s1395_s7 = smov [#allocation6]  }
  0x27   : > { %p1203_p3 = scmp.ne.s32.totalorder %s1490_s8, %s1202_s25  ;;  %s1207_s10 = sshll.u32 %s1395_s7, 4  ;;  %s1208_s10 = int_to_ptr.vmem [resolvable:$false] %s1207_s10 }
  0x28   : > { %s1209_s11 = scalar_lea.vmem %s1208_s10, 2048  ;;  %p1210_p7 = scmp.lt.s32.totalorder %s1490_s8, %s1208_s10 }
  0x29   : > { %p1205_p4 = pnand %p1203_p3, %p1509_p8  ;;  %p1211_p9 = scmp.lt.s32.totalorder %s1209_s11, %s1202_s25 }
  0x2b   : > { %p1206_p5 = pneg %p1205_p4  ;;  %p1212_p11 = por %p1211_p9, %p1210_p7 }
  0x2d   : > { %p1213_p12 = pnand %p1212_p11, %p1206_p5 }
  0x2f   : > { %1216 = shalt.err (!%p1213_p12)
}
  0x30   : > { %s1750_s14 = smov 192   ;;  %s1751_s23 = smov 64  }
  0x31   : > { %s1398_s24 = smov 4   ;;  %s1537_s30 = sadd.s32 4294967295, %s1393_s20  }
  0x32   : > { %1078 = dma.hbm_to_vmem [thread:$0]  (!%p1494_p6), %s1487_s6, 1024, %s1490_s8, %s1503_s13, %s1750_s14, %s1751_s23, %s1398_s24  }
  0x33   : > { %p80_p10 = scmp.ne.s32.totalorder %s1377_s16, %s1373_s15  ;;  %p1753_p13 = scmp.eq.s32.totalorder %s1537_s30, 0 }
  0x34   : > { %p895_p0 = scmp.ge.s32.totalorder %s1393_s20, 1  ;;  %p169_p1 = scmp.lt.s32.totalorder %s1393_s20, 4 }
  0x35   : > { %p1546_p2 = por %p1753_p13, %p80_p10  ;;  %s1399_s8 = smov [#allocation3]  }
  0x36   : > { %p1550_p3 = pnand %p895_p0, %p169_p1  ;;  %s184_s29 = sshll.u32 %s1399_s8, 4  ;;  %s1556_s29 = int_to_ptr.vmem [resolvable:$true] %s184_s29 }
  0x37   : > { %s1767_s5 = scalar_select %p1546_p2, 1, 0 }
  0x38   : > { %s1768_s6 = scalar_select %p1550_p3, 1, 0 }
  0x39   : > { %p1071_p4 = pneg %p1550_p3  ;;  %s222_s15 = scalar_lea.vmem [#allocation8], %s1481_s28 }
  0x3a   : > { %s228_s25 = sshll.u32 %s222_s15, 4  ;;  %s1217_s10 = scalar_lea.hbm %s1501_s12, 1024  ;;  %s1565_s25 = int_to_ptr.vmem [resolvable:$true] %s228_s25 }
  0x3b   : > { %p1561_p5 = pnand %p1071_p4, %p1753_p13  ;;  %p1218_p7 = scmp.ne.s32.totalorder %s1501_s12, %s1217_s10 }
  0x3c   : > { %s1222_s26 = scalar_lea.hbm %s1765_s2, 3072  ;;  %p1223_p12 = scmp.lt.u32.totalorder %s1501_s12, %s1765_s2 }
  0x3d   : > { %s1769_s7 = scalar_select %p1561_p5, 1, 0 }
  0x3e   : > { %p1220_p9 = pnand %p1218_p7, %p1509_p8  ;;  %p1224_p10 = scmp.lt.u32.totalorder %s1222_s26, %s1217_s10 }
  0x3f   : > { %p1226_p1 = scmp.lt.u32.totalorder %s1217_s10, %s1501_s12 }
  0x40   : > { %p1221_p11 = pneg %p1220_p9  ;;  %p1225_p0 = por %p1224_p10, %p1223_p12 }
  0x42   : > { %p1227_p4 = por %p1226_p1, %p1225_p0 }
  0x44   : > { %p1228_p13 = pnand %p1227_p4, %p1221_p11 }
  0x46   : > { %1231 = shalt.err (!%p1228_p13)
}
  0x47   : > { %s1232_s15 = scalar_lea.vmem %s1565_s25, 1024  ;;  %s1400_s11 = smov [#allocation8]  }
  0x48   : > { %p1233_p7 = scmp.ne.s32.totalorder %s1565_s25, %s1232_s15  ;;  %s1237_s8 = sshll.u32 %s1400_s11, 4  ;;  %s1238_s8 = int_to_ptr.vmem [resolvable:$false] %s1237_s8 }
  0x49   : > { %s1239_s14 = scalar_lea.vmem %s1238_s8, 2048  ;;  %p1240_p3 = scmp.lt.s32.totalorder %s1565_s25, %s1238_s8 }
  0x4a   : > { %p1235_p9 = pnand %p1233_p7, %p1509_p8  ;;  %p1241_p5 = scmp.lt.s32.totalorder %s1239_s14, %s1232_s15 }
  0x4c   : > { %p1236_p2 = pneg %p1235_p9  ;;  %p1242_p12 = por %p1241_p5, %p1240_p3 }
  0x4e   : > { %p1243_p10 = pnand %p1242_p12, %p1236_p2 }
  0x50   : > { %1246 = shalt.err (!%p1243_p10)
}
  0x51   : > { %s1770_s26 = smov 64   ;;  %s1771_s23 = smov 192  }
  0x52   : > { %1081 = dma.hbm_to_vmem [thread:$0]  (!%p1494_p6), %s1501_s12, 1024, %s1565_s25, %s1503_s13, %s1771_s23, %s1770_s26, %s1398_s24  }
  0x53   : > { %s1247_s11 = scalar_lea.hbm %s1744_s0, 256  ;;  %p1772_p2 = scmp.ne.s32.totalorder %s1769_s7, 0 }
  0x54   : > { %p1248_p13 = scmp.ne.s32.totalorder %s1744_s0, %s1247_s11  ;;  %p1254_p0 = scmp.lt.u32.totalorder %s1247_s11, %s1744_s0 }
  0x55   : > { %p1249_p3 = pneg %p1772_p2 }
  0x57   : > { %p1250_p5 = pnand %p1249_p3, %p1248_p13 }
  0x59   : > { %p1251_p11 = pneg %p1250_p5 }
  0x5b   : > { %p1256_p1 = pnand %p1254_p0, %p1251_p11 }
  0x5d   : > { %1259 = shalt.err (!%p1256_p1)
}
  0x5e   : > { %s1260_s12 = scalar_lea.vmem %s1556_s29, 256  ;;  %p1268_p12 = scmp.lt.s32.totalorder %s1556_s29, %s1556_s29 }
  0x5f   : > { %p1261_p4 = scmp.ne.s32.totalorder %s1556_s29, %s1260_s12  ;;  %p1269_p10 = scmp.lt.s32.totalorder %s1260_s12, %s1260_s12 }
  0x61   : > { %p1263_p7 = pnand %p1261_p4, %p1249_p3  ;;  %p1270_p6 = por %p1269_p10, %p1268_p12 }
  0x63   : > { %p1264_p9 = pneg %p1263_p7 }
  0x65   : > { %p1271_p8 = pnand %p1270_p6, %p1264_p9 }
  0x67   : > { %1274 = shalt.err (!%p1271_p8)
}
  0x68   : > { %1074 = dma.hbm_to_vmem [thread:$0]  (!%p1772_p2), %s1744_s0, 256, %s1556_s29, [#allocation4], %s1770_s26, %s1770_s26, %s1398_s24  }
  0x69   : > { %s951_s13 = sshll.u32 %s1389_s19, 10  ;;  %s242_s25 = scalar_lea.vmem [#allocation9], %s1481_s28 }
  0x6a   : > { %s249_s23 = sshll.u32 %s242_s25, 4  ;;  %s1621_s8 = scalar_lea.hbm %s1747_s3, %s951_s13  ;;  %s1623_s23 = int_to_ptr.vmem [resolvable:$true] %s249_s23 }
  0x6b   : > { %s1773_s7 = sand.u32 1, %s1381_s17   ;;  %s1275_s14 = scalar_lea.hbm %s1621_s8, 1024 }
  0x6c   : > { %s1627_s15 = scalar_lea.sflag [#allocation10], %s1773_s7  ;;  %p1276_p6 = scmp.ne.s32.totalorder %s1621_s8, %s1275_s14 }
  0x6d   : > { %p1774_p8 = scmp.ne.s32.totalorder %s1766_s22, 0  ;;  %s1280_s12 = scalar_lea.hbm %s1747_s3, 3072 }
  0x6e   : > { %p1281_p3 = scmp.lt.u32.totalorder %s1621_s8, %s1747_s3  ;;  %p1282_p5 = scmp.lt.u32.totalorder %s1280_s12, %s1275_s14 }
  0x6f   : > { %p1278_p13 = pnand %p1276_p6, %p1774_p8  ;;  %p1284_p0 = scmp.lt.u32.totalorder %s1275_s14, %s1621_s8 }
  0x70   : > { %p1283_p11 = por %p1282_p5, %p1281_p3 }
  0x71   : > { %p1279_p2 = pneg %p1278_p13 }
  0x72   : > { %p1285_p1 = por %p1284_p0, %p1283_p11 }
  0x74   : > { %p1286_p4 = pnand %p1285_p1, %p1279_p2 }
  0x76   : > { %1289 = shalt.err (!%p1286_p4)
}
  0x77   : > { %s1290_s13 = scalar_lea.vmem %s1623_s23, 1024  ;;  %s1401_s25 = smov [#allocation9]  }
  0x78   : > { %p1291_p7 = scmp.ne.s32.totalorder %s1623_s23, %s1290_s13  ;;  %s1295_s10 = sshll.u32 %s1401_s25, 4  ;;  %s1296_s10 = int_to_ptr.vmem [resolvable:$false] %s1295_s10 }
  0x79   : > { %s1297_s11 = scalar_lea.vmem %s1296_s10, 2048  ;;  %p1298_p10 = scmp.lt.s32.totalorder %s1623_s23, %s1296_s10 }
  0x7a   : > { %p1293_p9 = pnand %p1291_p7, %p1774_p8  ;;  %p1299_p6 = scmp.lt.s32.totalorder %s1297_s11, %s1290_s13 }
  0x7c   : > { %p1294_p12 = pneg %p1293_p9  ;;  %p1300_p13 = por %p1299_p6, %p1298_p10 }
  0x7e   : > { %p1301_p3 = pnand %p1300_p13, %p1294_p12 }
  0x80   : > { %1304 = shalt.err (!%p1301_p3)
}
  0x81   : > { %p1775_p2 = scmp.ne.s32.totalorder %s1764_s9, 0  ;;  %p1776_p8 = scmp.ne.s32.totalorder %s1768_s6, 0 }
  0x82   : > { %p1777_p5 = scmp.eq.s32.totalorder (!%p1776_p8), %s1537_s30, 0 }
  0x83   : > { %1084 = dma.hbm_to_vmem [thread:$0]  (!%p1775_p2), %s1621_s8, 1024, %s1623_s23, %s1627_s15, %s1770_s26, %s1770_s26, %s1398_s24  }
  0x84   : > { %261 = sbr.rel (%p1776_p8) target bundleno = 691 (0x2b3), region = 36 }
  0x8b   : > { %1356 = dma.done.wait (%p1777_p5), [#allocation4], 256   ;;  %p1778_p11 = pmov %p1777_p5 }
  0x8c   : > { %s267_s9 = sand.u32 1, %s1537_s30   ;;  %s269_s22 = sand.u32 1, %s1377_s16  }
  0x8d   : > { %1358 = vsyncadd (%p1778_p11), [#allocation4], 4294967040  ;;  %s907_s7 = sshll.u32 %s269_s22, 6  ;;  %s268_s14 = scalar_lea.sflag [#allocation7], %s267_s9 }
  0x8e   : > { %s1662_s28 = scalar_lea.vmem [#allocation6], %s907_s7  ;;  %p1779_p0 = scmp.ne.s32.totalorder %s1767_s5, 0 }
  0x90   : > { %1360 = dma.done.wait (%p1779_p0), %s268_s14, 2048  }
  0x91   : > { %1362 = vsyncadd (%p1779_p0), %s268_s14, 4294965248  ;;  %s1668_s24 = scalar_lea.vmem [#allocation8], %s907_s7  ;;  %s286_s6 = scalar_lea.sflag [#allocation10], %s269_s22 }
  0x92   : > { %s1670_s26 = scalar_lea.vmem [#allocation9], %s907_s7 }
  0x93   : > { %1364 = dma.done.wait (%p1779_p0), %s286_s6, 1024  }
  0x94   : > { %1366 = vsyncadd (%p1779_p0), %s286_s6, 4294966272  ;;  %v1145_v0 = vld [vmem:[%s1662_s28] sm:$0xff]   ;;  %v1146_v1 = vld [vmem:[%s1662_s28 + $0x8] sm:$0xff]   ;;  %p940_p1 = scmp.ne.s32.totalorder %s1385_s18, 0 }
  0x95   : > { %997 = vmatprep.subr.bf16.mxu0 %v1145_v0  ;;  %v1147_v2 = vld [vmem:[%s1662_s28 + $0x10] sm:$0xff]   ;;  %v1152_v3 = vld [vmem:[%s1668_s24] sm:$0xff]   ;;  %v1148_v4 = vld [vmem:[%s1662_s28 + $0x18] sm:$0xff]  }
  0x96   : > { %998 = vmatpush3.bf16.msra.mxu0 %v1145_v0  ;;  %1017 = vmatprep.subr.bf16.mxu1 %v1152_v3  ;;  %v1154_v5 = vld [vmem:[%s1668_s24 + $0x8] sm:$0xff]   ;;  %v1155_v6 = vld [vmem:[#allocation3] sm:$0xff]   ;;  %v1149_v7 = vld [vmem:[%s1662_s28 + $0x20] sm:$0xff]  }
  0x97   : > { %999 = vmatprep.subr.bf16.mxu0 %v1146_v1  ;;  %1018 = vmatpush3.bf16.msra.mxu1 %v1152_v3  ;;  %v1157_v8 = vld [vmem:[%s1668_s24 + $0x10] sm:$0xff]   ;;  %v1158_v9 = vld [vmem:[%s1668_s24 + $0x18] sm:$0xff]   ;;  %v1150_v10 = vld [vmem:[%s1662_s28 + $0x28] sm:$0xff]  }
  0x98   : > { %1019 = vmatprep.subr.bf16.mxu1 %v1154_v5  ;;  %1013 = vmatprep.mubr.bf16.mxu0 %v1155_v6  ;;  %v1159_v11 = vld [vmem:[%s1668_s24 + $0x20] sm:$0xff]   ;;  %v1151_v12 = vld [vmem:[%s1662_s28 + $0x30] sm:$0xff]   ;;  %v1160_v13 = vld [vmem:[%s1668_s24 + $0x28] sm:$0xff]  }
  0x99   : > { %1033 = vmatprep.mubr.bf16.mxu1 %v1155_v6  ;;  %v1153_v14 = vld [vmem:[%s1662_s28 + $0x38] sm:$0xff]   ;;  %v1161_v15 = vld [vmem:[%s1668_s24 + $0x30] sm:$0xff]   ;;  %v1163_v18 = vld [vmem:[%s1670_s26] sm:$0xff]  }
  0x9a   : > { %1000 = vmatpush3.bf16.msra.mxu0 %v1146_v1  ;;  %v1156_v16 = vld [vmem:[#allocation3 + $0x8] sm:$0xff]   ;;  %v1164_v19 = vld [vmem:[%s1670_s26 + $0x8] sm:$0xff]   ;;  %v1165_v20 = vld [vmem:[%s1670_s26 + $0x10] sm:$0xff]  }
  0x9b   : > { %1001 = vmatprep.subr.bf16.mxu0 %v1147_v2  ;;  %1020 = vmatpush3.bf16.msra.mxu1 %v1154_v5  ;;  %v1162_v17 = vld [vmem:[%s1668_s24 + $0x38] sm:$0xff]   ;;  %v1167_v22 = vld [vmem:[%s1670_s26 + $0x20] sm:$0xff]   ;;  %v1168_v23 = vld [vmem:[%s1670_s26 + $0x28] sm:$0xff]  }
  0x9c   : > { %1021 = vmatprep.subr.bf16.mxu1 %v1157_v8  ;;  %v1166_v21 = vld [vmem:[%s1670_s26 + $0x18] sm:$0xff]   ;;  %v1169_v24 = vld [vmem:[%s1670_s26 + $0x30] sm:$0xff]  }
  0x9d   : > { %v1170_v25 = vld [vmem:[%s1670_s26 + $0x38] sm:$0xff]  }
  0x9e   : > { %1002 = vmatpush3.bf16.msra.mxu0 %v1147_v2 }
  0x9f   : > { %1003 = vmatprep.subr.bf16.mxu0 %v1148_v4  ;;  %1022 = vmatpush3.bf16.msra.mxu1 %v1157_v8 }
  0xa0   : > { %1023 = vmatprep.subr.bf16.mxu1 %v1158_v9 }
  0xa2   : > { %1004 = vmatpush3.bf16.msra.mxu0 %v1148_v4 }
  0xa3   : > { %1005 = vmatprep.subr.bf16.mxu0 %v1149_v7  ;;  %1024 = vmatpush3.bf16.msra.mxu1 %v1158_v9 }
  0xa4   : > { %1025 = vmatprep.subr.bf16.mxu1 %v1159_v11 }
  0xa6   : > { %1006 = vmatpush3.bf16.msra.mxu0 %v1149_v7 }
  0xa7   : > { %1007 = vmatprep.subr.bf16.mxu0 %v1150_v10  ;;  %1026 = vmatpush3.bf16.msra.mxu1 %v1159_v11 }
  0xa8   : > { %1027 = vmatprep.subr.bf16.mxu1 %v1160_v13 }
  0xaa   : > { %1008 = vmatpush3.bf16.msra.mxu0 %v1150_v10 }
  0xab   : > { %1009 = vmatprep.subr.bf16.mxu0 %v1151_v12  ;;  %1028 = vmatpush3.bf16.msra.mxu1 %v1160_v13 }
  0xac   : > { %1029 = vmatprep.subr.bf16.mxu1 %v1161_v15 }
  0xae   : > { %1010 = vmatpush3.bf16.msra.mxu0 %v1151_v12 }
  0xaf   : > { %1011 = vmatprep.subr.bf16.mxu0 %v1153_v14  ;;  %1030 = vmatpush3.bf16.msra.mxu1 %v1161_v15 }
  0xb0   : > { %1031 = vmatprep.subr.bf16.mxu1 %v1162_v17 }
  0xb2   : > { %1012 = vmatpush3.bf16.msra.mxu0 %v1153_v14 }
  0xb3   : > { %1032 = vmatpush3.bf16.msra.mxu1 %v1162_v17  ;;  %1037 = vmatprep.subr.bf16.mxu0 %v1163_v18 }
  0xb5   : > { %1014 = vmatmul.mubr.bf16.vlgmr.msra.gmra.mrb[0].mxu0 %v1156_v16 }
  0xb6   : > { %1034 = vmatmul.mubr.bf16.vlgmr.msra.gmra.mrb[0].mxu1 %v1156_v16  ;;  %1038 = vmatpush3.bf16.msra.mxu0 %v1163_v18 }
  0xb7   : > { %1039 = vmatprep.subr.bf16.mxu0 %v1164_v19 }
  0xba   : > { %1040 = vmatpush3.bf16.msra.mxu0 %v1164_v19 }
  0xbb   : > { %1041 = vmatprep.subr.bf16.mxu0 %v1165_v20 }
  0xbe   : > { %1042 = vmatpush3.bf16.msra.mxu0 %v1165_v20 }
  0xbf   : > { %1043 = vmatprep.subr.bf16.mxu0 %v1166_v21 }
  0xc2   : > { %1044 = vmatpush3.bf16.msra.mxu0 %v1166_v21 }
  0xc3   : > { %1045 = vmatprep.subr.bf16.mxu0 %v1167_v22 }
  0xc6   : > { %1046 = vmatpush3.bf16.msra.mxu0 %v1167_v22 }
  0xc7   : > { %1047 = vmatprep.subr.bf16.mxu0 %v1168_v23 }
  0xca   : > { %1048 = vmatpush3.bf16.msra.mxu0 %v1168_v23 }
  0xcb   : > { %1049 = vmatprep.subr.bf16.mxu0 %v1169_v24 }
  0xce   : > { %1050 = vmatpush3.bf16.msra.mxu0 %v1169_v24 }
  0xcf   : > { %1051 = vmatprep.subr.bf16.mxu0 %v1170_v25 }
  0xd2   : > { %1052 = vmatpush3.bf16.msra.mxu0 %v1170_v25 }
 0x188   : > { %v1015_v26 = vpop.f32.mrb[0].mxu0 }
 0x189   : > { %v930_v27 = vmul.f32 -1.442695, %v1015_v26  ;;  %v437_v28 = vpop.f32.mrb[1].mxu0  ;;  %v1035_v34 = vpop.f32.mrb[0].mxu1 }
 0x18a   : > { %v928_v29 = vmul.f32 -1.442695, %v437_v28  ;;  %v1016_v30 = vpop.f32.mrb[2].mxu0  ;;  %v550_v35 = vpop.f32.mrb[1].mxu1 }
 0x18b   : > { %1171 = vpow2.f32 %v930_v27  ;;  %v931_v31 = vmul.f32 -1.442695, %v1016_v30  ;;  %v440_v32 = vpop.f32.mrb[3].mxu0  ;;  %v1036_v36 = vpop.f32.mrb[2].mxu1 }
 0x18c   : > { %1173 = vpow2.f32 %v928_v29  ;;  %v929_v33 = vmul.f32 -1.442695, %v440_v32  ;;  %v553_v37 = vpop.f32.mrb[3].mxu1 }
 0x18d   : > { %1175 = vpow2.f32 %v931_v31 }
 0x18e   : > { %1177 = vpow2.f32 %v929_v33 }
 0x195   : > { %v1172_v38 = vpop.eup %1171 }
 0x196   : > { %v1174_v39 = vpop.eup %1173  ;;  %v579_v40 = vadd.f32 1.0, %v1172_v38 }
 0x197   : > { %v1176_v41 = vpop.eup %1175  ;;  %v577_v42 = vadd.f32 1.0, %v1174_v39 }
 0x198   : > { %v1178_v43 = vpop.eup %1177  ;;  %1179 = vrcp.f32 %v579_v40  ;;  %v580_v44 = vadd.f32 1.0, %v1176_v41 }
 0x199   : > { %1181 = vrcp.f32 %v577_v42  ;;  %v578_v45 = vadd.f32 1.0, %v1178_v43 }
 0x19a   : > { %1183 = vrcp.f32 %v580_v44 }
 0x19b   : > { %1185 = vrcp.f32 %v578_v45 }
 0x1a2   : > { %v1180_v46 = vpop.eup %1179 }
 0x1a3   : > { %v1182_v47 = vpop.eup %1181  ;;  %v591_v48 = vmul.f32 %v1180_v46, %v1015_v26 }
 0x1a4   : > { %v1184_v49 = vpop.eup %1183  ;;  %v589_v50 = vmul.f32 %v1182_v47, %v437_v28 }
 0x1a5   : > { %v1186_v51 = vpop.eup %1185  ;;  %v592_v52 = vmul.f32 %v1184_v49, %v1016_v30  ;;  %v595_v53 = vmul.f32 %v1035_v34, %v591_v48 }
 0x1a6   : > { %v590_v54 = vmul.f32 %v1186_v51, %v440_v32  ;;  %v593_v55 = vmul.f32 %v589_v50, %v550_v35 }
 0x1a7   : > { %v596_v56 = vmul.f32 %v1036_v36, %v592_v52 }
 0x1a8   : > { %v594_v57 = vmul.f32 %v590_v54, %v553_v37 }
 0x1a9   : > { %v598_v58 = vpack.c.bf16 %v596_v56, %v595_v53 }
 0x1aa   : > { %v597_v59 = vpack.c.bf16 %v594_v57, %v593_v55 }
 0x1ac   : > { %1053 = vmatprep.mubr.bf16.mxu0 %v597_v59 }
 0x1ad   : > { %1054 = vmatmul.mubr.bf16.vlgmr.msra.gmra.mrb[4].mxu0 %v598_v58 }
 0x27d   : > { %715 = sbr.rel (%p940_p1) target bundleno = 645 (0x285), region = 56 }
 0x280   : > { %v1055_v60 = vpop.f32.mrb[4].mxu0 }
 0x281   : > { %v697_v61 = vpop.f32.mrb[5].mxu0  ;;  %718 = vst [vmem:[#allocation2 + $0x10] sm:$0xff] (!%p940_p1), %v1055_v60 }
 0x282   : > { %v1056_v62 = vpop.f32.mrb[6].mxu0  ;;  %716 = vst [vmem:[#allocation2] sm:$0xff] (!%p940_p1), %v697_v61 }
 0x283   : > { %v700_v63 = vpop.f32.mrb[7].mxu0  ;;  %719 = vst [vmem:[#allocation2 + $0x18] sm:$0xff] (!%p940_p1), %v1056_v62 }
 0x284   : > { %717 = vst [vmem:[#allocation2 + $0x8] sm:$0xff] %v700_v63 }
 0x285 PF: > { %p941_p4 = scmp.le.s32.totalorder %s1385_s18, 0 }
 0x287   : > { %723 = sbr.rel (%p941_p4) target bundleno = 655 (0x28f), region = 60 }
 0x289   : > { %v726_v2 = vld [vmem:[#allocation2 + $0x10] sm:$0xff] (!%p941_p4) }
 0x28a   : > { %v724_v0 = vld [vmem:[#allocation2] sm:$0xff] (!%p941_p4)  ;;  %v730_v5 = vadd.f32 (!%p941_p4), %v1055_v60, %v726_v2 }
 0x28b   : > { %v725_v1 = vld [vmem:[#allocation2 + $0x8] sm:$0xff] (!%p941_p4)  ;;  %v728_v3 = vadd.f32 (!%p941_p4), %v724_v0, %v697_v61  ;;  %v727_v6 = vld [vmem:[#allocation2 + $0x18] sm:$0xff] (!%p941_p4) }
 0x28c   : > { %v729_v4 = vadd.f32 (!%p941_p4), %v725_v1, %v700_v63  ;;  %v731_v7 = vadd.f32 (!%p941_p4), %v1056_v62, %v727_v6  ;;  %734 = vst [vmem:[#allocation2 + $0x10] sm:$0xff] (!%p941_p4), %v730_v5 }
 0x28d   : > { %732 = vst [vmem:[#allocation2] sm:$0xff] (!%p941_p4), %v728_v3 }
 0x28e   : > { %733 = vst [vmem:[#allocation2 + $0x8] sm:$0xff] %v729_v4  ;;  %735 = vst [vmem:[#allocation2 + $0x18] sm:$0xff] %v731_v7 }
 0x28f PF: > { %p942_p7 = scmp.ne.s32.totalorder %s1385_s18, 2 }
 0x291   : > { %739 = sbr.rel (%p942_p7) target bundleno = 665 (0x299), region = 64 }
 0x294   : > { %v742_v10 = vld [vmem:[#allocation2 + $0x10] sm:$0xff] (!%p942_p7) }
 0x295   : > { %v740_v8 = vld [vmem:[#allocation2] sm:$0xff] (!%p942_p7)  ;;  %v741_v9 = vld [vmem:[#allocation2 + $0x8] sm:$0xff] (!%p942_p7)  ;;  %v743_v12 = vld [vmem:[#allocation2 + $0x18] sm:$0xff] (!%p942_p7) }
 0x296   : > { %v959_v11 = vpack.c.bf16 (!%p942_p7), %v741_v9, %v740_v8  ;;  %v964_v13 = vpack.c.bf16 (!%p942_p7), %v743_v12, %v742_v10 }
 0x298   : > { %960 = vst [vmem:[#allocation11] sm:$0xff] %v959_v11   ;;  %966 = vst [vmem:[#allocation11 + $0x8] sm:$0xff] %v964_v13  }
 0x299 PF: > { %p1088_p9 = scmp.eq.s32.totalorder %s1537_s30, 2  ;;  %s1402_s5 = smov [#allocation11]  }
 0x29a   : > { %s773_s23 = sshll.u32 %s1402_s5, 4  ;;  %s774_s23 = int_to_ptr.vmem [resolvable:$true] %s773_s23 }
 0x29b   : > { %s1305_s8 = scalar_lea.vmem %s774_s23, 256  ;;  %p1312_p13 = scmp.lt.s32.totalorder %s774_s23, %s774_s23 }
 0x29c   : > { %p1306_p12 = scmp.ne.s32.totalorder %s774_s23, %s1305_s8  ;;  %p1313_p3 = scmp.lt.s32.totalorder %s1305_s8, %s1305_s8 }
 0x29e   : > { %p1307_p10 = pnand %p1306_p12, %p1088_p9  ;;  %p1314_p2 = por %p1313_p3, %p1312_p13 }
 0x2a0   : > { %p1308_p6 = pneg %p1307_p10 }
 0x2a2   : > { %p1315_p8 = pnand %p1314_p2, %p1308_p6 }
 0x2a4   : > { %1318 = shalt.err (!%p1315_p8)
}
 0x2a5   : > { %s1319_s29 = scalar_lea.hbm %s1748_s4, 256 }
 0x2a6   : > { %p1320_p5 = scmp.ne.s32.totalorder %s1748_s4, %s1319_s29  ;;  %p1325_p1 = scmp.lt.u32.totalorder %s1319_s29, %s1748_s4 }
 0x2a8   : > { %p1321_p11 = pnand %p1320_p5, %p1088_p9 }
 0x2aa   : > { %p1322_p0 = pneg %p1321_p11 }
 0x2ac   : > { %p1327_p4 = pnand %p1325_p1, %p1322_p0 }
 0x2ae   : > { %1330 = shalt.err (!%p1327_p4)
}
 0x2af   : > { %s1403_s25 = smov 64   ;;  %s1404_s10 = smov 4  }
 0x2b0   : > { %1068 = dma.vmem_to_hbm [thread:$0]  (%p1088_p9), %s774_s23, 256, %s1748_s4, [#allocation5], %s1403_s25, %s1403_s25, %s1404_s10  }
 0x2b1   : > { %1368 = dma.done.wait (%p1088_p9), [#allocation5], 256  }
 0x2b2   : > { %1370 = vsyncadd (%p1088_p9), [#allocation5], 4294967040 }
 0x2b3 PF: > { %s22_s20 = sadd.s32 1, %s1393_s20   ;;  %s1780_s15 = smov %s1377_s16 }
 0x2b4   : > { %p19_p7 = scmp.ge.s32.totalorder %s22_s20, 5   ;;  %s1781_s16 = smov %s1381_s17 }
 0x2b5   : > { %s1782_s17 = smov %s1477_s27  ;;  %s1783_s18 = smov %s1389_s19 }
 0x2b6   : > { %s1784_s19 = smov %s1786_s21  ;;  %21 = sbr.rel (!%p19_p7) target bundleno = 11 (0xb), region = 116 }
 0x2bd   :  { %789 = vsyncpa [#allocation4], 1 }
 0x2be   :  { %791 = vsyncpa [#allocation4 + $0x1], 1 }
 0x2bf   :  { %792 = vsyncpa [#allocation7], 1 }
 0x2c0   :  { %794 = vsyncpa [#allocation7 + $0x1], 1 }
 0x2c1   :  { %795 = vsyncpa [#allocation10], 1 }
 0x2c2   :  { %797 = vsyncpa [#allocation10 + $0x1], 1 }
 0x2c3   :  { %798 = vsyncpa [#allocation5], 1 }
 0x2c4   :  { %800 = vsyncpa [#allocation5 + $0x1], 1 }

</bundles_post_ra>
